<compile_context>
chip_gen: v7x
topology: tpu7x:2x2x1
jax: 0.10.0
libtpu: 0.0.40
codegen_flags: <defaults>
</compile_context>

<pallas_src>
import functools

import jax
import jax.numpy as jnp
from jax.experimental import pallas as pl
from jax.experimental.pallas import tpu as pltpu

WS_EPS = 1e-5            # WeightStandardizedConv2d eps for float32 inputs
GN_EPS = 1e-5            # nn.GroupNorm default eps
_LANE = 128              # TPU lane width; channels padded to multiples of this
_PAD_L = 16              # left zero margin on W (bf16-sublane-aligned interior store)


def _round_up(n, m):
    return ((n + m - 1) // m) * m


def _pad_dim(a, axis, size):
    if a.shape[axis] == size:
        return a
    pads = [(0, 0)] * a.ndim
    pads[axis] = (0, size - a.shape[axis])
    return jnp.pad(a, pads)


def _vmem_limit(needed_bytes):
    """Per-generation VMEM limit derived from actual footprint + HW capacity."""
    try:
        cap = int(pltpu.get_tpu_info().vmem_capacity_bytes)
    except Exception:
        cap = 64 << 20
    return int(max(32 << 20, min(needed_bytes + (8 << 20), cap - (2 << 20))))


# ----------------------------------------------------------------------------
# Kernels
# ----------------------------------------------------------------------------
def _ws_kernel(w_ref, o_ref):
    """Weight standardization: per output channel over (kh, kw, cin).

    w_ref / o_ref : (9*Cin, Cout)   (unpadded; run once per conv, not per step)
    """
    w = w_ref[...]
    mean = jnp.mean(w, axis=0, keepdims=True)
    var = jnp.mean((w - mean) ** 2, axis=0, keepdims=True)
    o_ref[...] = (w - mean) * jax.lax.rsqrt(var + WS_EPS)


def _zero_halo(xp_ref, *, H, W):
    """Zero only the halo rows/cols that the 3x3 taps actually read."""
    Wp, C = xp_ref.shape[1], xp_ref.shape[2]
    zrow = jnp.zeros((1, Wp, C), xp_ref.dtype)
    zcol = jnp.zeros((H + 2, 1, C), xp_ref.dtype)
    xp_ref[0:1, :, :] = zrow                              # top halo row
    xp_ref[H + 1:H + 2, :, :] = zrow                      # bottom halo row
    xp_ref[:, _PAD_L - 1:_PAD_L, :] = zcol                # left halo col
    xp_ref[:, _PAD_L + W:_PAD_L + W + 1, :] = zcol        # right halo col


def _conv3x3_gn(xp_ref, w_ref, b_ref, g_ref, be_ref, mix_ref, *, H, W, C):
    """3x3 same conv (pre-standardized, matmul_dtype weights) + bias -> GroupNorm.

    xp_ref  : (H+2, W+_PAD_L+1, C) zero-haloed image scratch (matmul_dtype)
    w_ref   : (9*C, Cout) weights, tap-major
    b/g/be  : (1, Cout) f32
    mix_ref : (Cout, Cout) precomputed group-mixing matrix (already /N)
    returns (H*W, Cout) GroupNorm-affine output (f32 value, no scratch ref).
    """
    Cout = w_ref.shape[-1]
    acc = jnp.zeros((H * W, Cout), jnp.float32)
    # 9 accumulating K=C matmuls over lane-aligned slabs (no im2col patch).
    for dh in range(3):
        for dw in range(3):
            tap = dh * 3 + dw
            c0 = _PAD_L - 1 + dw
            slab = xp_ref[dh:dh + H, c0:c0 + W, :].reshape(H * W, C)
            acc = acc + jnp.dot(slab, w_ref[tap * C:(tap + 1) * C, :],
                                preferred_element_type=jnp.float32)
    acc = acc + b_ref[...]

    # GroupNorm: two-pass stats, group reduction via the mixing matrix
    # (padded channels form a zero group and stay exactly zero).
    s1 = jnp.sum(acc, axis=0, keepdims=True)
    mean_c = jnp.dot(s1, mix_ref[...], preferred_element_type=jnp.float32)
    xc = acc - mean_c
    s2 = jnp.sum(xc * xc, axis=0, keepdims=True)
    var_c = jnp.dot(s2, mix_ref[...], preferred_element_type=jnp.float32)
    y = xc * jax.lax.rsqrt(var_c + GN_EPS)
    return y * g_ref[...] + be_ref[...]


def _resnet_kernel(x_ref, emb_ref, w1_ref, b1_ref, g1_ref, be1_ref,
                   w2_ref, b2_ref, g2_ref, be2_ref, mix_ref, *rest,
                   H, W, Cin_p, Cp, use_proj, matmul_dtype):
    """Fused ResnetBlock: (WS-conv+GN+FiLM+SiLU) -> (WS-conv+GN+SiLU) + residual."""
    if use_proj:
        wr_ref, br_ref, o_ref, xp1_ref, xp2_ref = rest
    else:
        o_ref, xp1_ref, xp2_ref = rest

    # Thin halo zeroing each step (cheap; correct under multi-core sharding).
    _zero_halo(xp1_ref, H=H, W=W)
    _zero_halo(xp2_ref, H=H, W=W)

    x = x_ref[0]                                          # (H, W, Cin_p) f32
    xp1_ref[1:H + 1, _PAD_L:_PAD_L + W, :] = x.astype(xp1_ref.dtype)

    # ---- block 1: WS-conv -> GroupNorm -> FiLM (precomputed emb) -> SiLU
    y = _conv3x3_gn(xp1_ref, w1_ref, b1_ref, g1_ref, be1_ref, mix_ref,
                    H=H, W=W, C=Cin_p)
    emb = emb_ref[0]                                      # (1, 2*Cp), f32
    y = y * (emb[:, :Cp] + 1.0) + emb[:, Cp:]
    y = y * jax.nn.sigmoid(y)                             # SiLU

    # h never leaves VMEM: write it (already cast) into conv2's padded scratch.
    xp2_ref[1:H + 1, _PAD_L:_PAD_L + W, :] = (
        y.reshape(H, W, Cp).astype(xp2_ref.dtype))

    # ---- block 2: WS-conv -> GroupNorm -> SiLU
    y = _conv3x3_gn(xp2_ref, w2_ref, b2_ref, g2_ref, be2_ref, mix_ref,
                    H=H, W=W, C=Cp)
    y = y * jax.nn.sigmoid(y)                             # SiLU

    # ---- fused residual: 1x1 conv projection, or plain add when dim == dim_out
    if use_proj:
        xr = x.reshape(H * W, Cin_p).astype(matmul_dtype)
        y = y + (jnp.dot(xr, wr_ref[...], preferred_element_type=jnp.float32)
                 + br_ref[...])
    else:
        y = y + x.reshape(H * W, Cp)
    o_ref[0] = y.reshape(H, W, Cp)


# ----------------------------------------------------------------------------
# Pallas wrappers
# ----------------------------------------------------------------------------
def weight_standardize(w_khwio):
    """One-shot weight standardization kernel on (3,3,Cin,Cout) weights."""
    kh, kw, cin, cout = w_khwio.shape
    w2d = w_khwio.reshape(kh * kw * cin, cout).astype(jnp.float32)
    out = pl.pallas_call(
        _ws_kernel,
        out_shape=jax.ShapeDtypeStruct(w2d.shape, jnp.float32),
        grid=(1,),
        in_specs=[pl.BlockSpec(w2d.shape, lambda i: (0, 0))],
        out_specs=pl.BlockSpec(w2d.shape, lambda i: (0, 0)),
    )(w2d)
    return out.reshape(kh, kw, cin, cout)


def _resnet_call(x, emb, w1, b1, g1, be1, w2, b2, g2, be2, mix, wr, br,
                 *, H, W, matmul_dtype):
    B, _, _, Cin_p = x.shape
    Cp = w1.shape[-1]
    use_proj = wr is not None
    Wp = W + _PAD_L + 1
    md = jnp.dtype(matmul_dtype).itemsize

    kernel = functools.partial(_resnet_kernel, H=H, W=W, Cin_p=Cin_p, Cp=Cp,
                               use_proj=use_proj, matmul_dtype=matmul_dtype)

    in_specs = [
        pl.BlockSpec((1, H, W, Cin_p), lambda i: (i, 0, 0, 0)),
        pl.BlockSpec((1, 1, 2 * Cp), lambda i: (i, 0, 0)),
        pl.BlockSpec((9 * Cin_p, Cp), lambda i: (0, 0)),
        pl.BlockSpec((1, Cp), lambda i: (0, 0)),
        pl.BlockSpec((1, Cp), lambda i: (0, 0)),
        pl.BlockSpec((1, Cp), lambda i: (0, 0)),
        pl.BlockSpec((9 * Cp, Cp), lambda i: (0, 0)),
        pl.BlockSpec((1, Cp), lambda i: (0, 0)),
        pl.BlockSpec((1, Cp), lambda i: (0, 0)),
        pl.BlockSpec((1, Cp), lambda i: (0, 0)),
        pl.BlockSpec((Cp, Cp), lambda i: (0, 0)),
    ]
    args = [x, emb, w1, b1, g1, be1, w2, b2, g2, be2, mix]
    if use_proj:
        in_specs += [pl.BlockSpec((Cin_p, Cp), lambda i: (0, 0)),
                     pl.BlockSpec((1, Cp), lambda i: (0, 0))]
        args += [wr, br]

    scratch_shapes = [
        pltpu.VMEM((H + 2, Wp, Cin_p), matmul_dtype),   # padded image for conv1
        pltpu.VMEM((H + 2, Wp, Cp), matmul_dtype),      # padded h for conv2
    ]

    # Footprint: double-buffered blocks + persistent scratch -> vmem limit.
    needed = (
        2 * H * W * Cin_p * 4                      # x block
        + 2 * H * W * Cp * 4                       # out block
        + 2 * 2 * Cp * 4                           # emb block
        + 2 * 9 * (Cin_p + Cp) * Cp * md           # conv weights
        + 2 * Cp * Cp * 4                          # mix
        + 2 * 6 * Cp * 4                           # biases / gammas / betas
        + (2 * (Cin_p * Cp * md + Cp * 4) if use_proj else 0)
        + (H + 2) * Wp * (Cin_p + Cp) * md)        # scratch

    cost = pl.CostEstimate(
        flops=2 * B * H * W * (9 * Cin_p * Cp + 9 * Cp * Cp
                               + (Cin_p * Cp if use_proj else 0)),
        transcendentals=2 * B * H * W * Cp,
        bytes_accessed=(4 * B * H * W * (Cin_p + Cp)
                        + md * 9 * (Cin_p + Cp) * Cp + 4 * Cp * Cp))

    return pl.pallas_call(
        kernel,
        out_shape=jax.ShapeDtypeStruct((B, H, W, Cp), jnp.float32),
        grid=(B,),
        in_specs=in_specs,
        out_specs=pl.BlockSpec((1, H, W, Cp), lambda i: (i, 0, 0, 0)),
        scratch_shapes=scratch_shapes,
        compiler_params=pltpu.CompilerParams(
            dimension_semantics=("parallel",),
            vmem_limit_bytes=_vmem_limit(needed)),
        cost_estimate=cost,
    )(*args)


def _group_mix(c_real, c_pad, groups, hw):
    """(c_pad, c_pad) matrix: mix[c1,c2] = 1/(cpg*H*W) if same (real) group."""
    cpg = c_real // groups
    idx = jnp.arange(c_pad)
    gid = idx // cpg
    real = idx < c_real
    same = (gid[:, None] == gid[None, :]) & real[:, None] & real[None, :]
    return jnp.where(same, 1.0 / (cpg * hw), 0.0).astype(jnp.float32)


# ----------------------------------------------------------------------------
# ResnetBlock forward (Pallas)
# ----------------------------------------------------------------------------
def resnet_block_forward(params, x_nchw, time_emb, matmul_dtype=jnp.bfloat16):
    """PyTorch ResnetBlock forward. x_nchw: (B, Cin, H, W); time_emb: (B, T) or None.

    matmul_dtype=jnp.bfloat16 (production default) halves MXU operand traffic
    on v5e/v6e/v7x; accumulation stays f32. Pass jnp.float32 for bit-tight runs.
    """
    B, Cin, H, W = x_nchw.shape
    Cout = params["w1_khwio"].shape[-1]
    groups = params["groups"]
    assert Cout % groups == 0, "GroupNorm requires groups to divide dim_out"
    Cin_p = _round_up(Cin, _LANE)
    Cp = _round_up(Cout, _LANE)

    # NCHW -> NHWC (channels on the lane dim), lane-dense channel padding.
    x = jnp.transpose(x_nchw, (0, 2, 3, 1)).astype(jnp.float32)
    x_p = _pad_dim(x, 3, Cin_p)

    # Weight standardization once, then pad + tap-major reshape + cast to
    # matmul_dtype (so no per-step casts of large operands happen in-kernel).
    w1s = weight_standardize(params["w1_khwio"])
    w2s = weight_standardize(params["w2_khwio"])
    w1p = _pad_dim(_pad_dim(w1s, 2, Cin_p), 3, Cp).reshape(
        9 * Cin_p, Cp).astype(matmul_dtype)
    w2p = _pad_dim(_pad_dim(w2s, 2, Cp), 3, Cp).reshape(
        9 * Cp, Cp).astype(matmul_dtype)

    def pad_vec(v):
        return _pad_dim(v.reshape(1, -1).astype(jnp.float32), 1, Cp)

    b1, g1, be1 = pad_vec(params["b1"]), pad_vec(params["g1"]), pad_vec(params["be1"])
    b2, g2, be2 = pad_vec(params["b2"]), pad_vec(params["g2"]), pad_vec(params["be2"])

    # time-MLP (SiLU -> Linear) precomputed in plain XLA; pad scale/shift halves
    # separately so the in-kernel split at Cp stays correct.
    if time_emb is not None and params.get("w_mlp_t") is not None:
        t = time_emb.astype(jnp.float32)
        t = t * jax.nn.sigmoid(t)
        emb = t @ params["w_mlp_t"].astype(jnp.float32) + params["b_mlp"].astype(jnp.float32)
        emb_p = jnp.concatenate([_pad_dim(emb[:, :Cout], 1, Cp),
                                 _pad_dim(emb[:, Cout:], 1, Cp)], axis=1)
    else:
        emb_p = jnp.zeros((B, 2 * Cp), jnp.float32)   # FiLM becomes identity
    emb_p = emb_p.reshape(B, 1, 2 * Cp)

    mix = _group_mix(Cout, Cp, groups, H * W)

    if params["w_res_io"] is not None:
        wr = _pad_dim(_pad_dim(params["w_res_io"].astype(jnp.float32), 0, Cin_p),
                      1, Cp).astype(matmul_dtype)
        br = pad_vec(params["b_res"])
    else:
        wr = br = None            # identity residual: plain add inside the kernel

    out = _resnet_call(x_p, emb_p, w1p, b1, g1, be1, w2p, b2, g2, be2, mix, wr, br,
                       H=H, W=W, matmul_dtype=matmul_dtype)

    out = out[..., :Cout]
    return jnp.transpose(out, (0, 3, 1, 2))                       # NHWC -> NCHW


# ----------------------------------------------------------------------------
# Pure-JAX reference (PyTorch semantics, NCHW) for verification
# ----------------------------------------------------------------------------
def ref_forward(p, x, time_emb, groups):
    Cout = p["w1"].shape[0]
    t = time_emb * jax.nn.sigmoid(time_emb)
    emb = t @ p["w_mlp"].T + p["b_mlp"]
    scale = emb[:, :Cout][:, :, None, None]
    shift = emb[:, Cout:][:, :, None, None]

    def ws_conv(x, w, b):
        m = jnp.mean(w, axis=(1, 2, 3), keepdims=True)
        v = jnp.mean((w - m) ** 2, axis=(1, 2, 3), keepdims=True)
        wn = (w - m) * jax.lax.rsqrt(v + WS_EPS)
        y = jax.lax.conv_general_dilated(
            x, wn, (1, 1), ((1, 1), (1, 1)),
            dimension_numbers=("NCHW", "OIHW", "NCHW"))
        return y + b[None, :, None, None]

    def groupnorm(x, gamma, beta):
        B, C, H, W = x.shape
        xg = x.reshape(B, groups, C // groups, H, W)
        mu = xg.mean(axis=(2, 3, 4), keepdims=True)
        va = ((xg - mu) ** 2).mean(axis=(2, 3, 4), keepdims=True)
        xn = (xg - mu) * jax.lax.rsqrt(va + GN_EPS)
        return (xn.reshape(B, C, H, W) * gamma[None, :, None, None]
                + beta[None, :, None, None])

    h = ws_conv(x, p["w1"], p["b1"])
    h = groupnorm(h, p["g1"], p["be1"])
    h = h * (scale + 1.0) + shift
    h = h * jax.nn.sigmoid(h)
    h = ws_conv(h, p["w2"], p["b2"])
    h = groupnorm(h, p["g2"], p["be2"])
    h = h * jax.nn.sigmoid(h)
    if p["w_res"] is None:
        res = x
    else:
        res = jax.lax.conv_general_dilated(
            x, p["w_res"], (1, 1), ((0, 0), (0, 0)),
            dimension_numbers=("NCHW", "OIHW", "NCHW")) + p["b_res"][None, :, None, None]
    return h + res


# ----------------------------------------------------------------------------
def _run_case(key, B, Cin, Cout, H, W, T, groups, matmul_dtype=None, tol=3e-3):
    ks = jax.random.split(key, 16)
    w1 = 0.2 * jax.random.normal(ks[0], (Cout, Cin, 3, 3), jnp.float32)
    b1 = 0.1 * jax.random.normal(ks[1], (Cout,), jnp.float32)
    g1 = 1.0 + 0.1 * jax.random.normal(ks[2], (Cout,), jnp.float32)
    be1 = 0.1 * jax.random.normal(ks[3], (Cout,), jnp.float32)
    w2 = 0.2 * jax.random.normal(ks[4], (Cout, Cout, 3, 3), jnp.float32)
    b2 = 0.1 * jax.random.normal(ks[5], (Cout,), jnp.float32)
    g2 = 1.0 + 0.1 * jax.random.normal(ks[6], (Cout,), jnp.float32)
    be2 = 0.1 * jax.random.normal(ks[7], (Cout,), jnp.float32)
    w_mlp = 0.2 * jax.random.normal(ks[8], (2 * Cout, T), jnp.float32)
    b_mlp = 0.1 * jax.random.normal(ks[9], (2 * Cout,), jnp.float32)

    identity = (Cin == Cout)
    if identity:
        w_res, b_res = None, None
    else:
        w_res = 0.2 * jax.random.normal(ks[10], (Cout, Cin, 1, 1), jnp.float32)
        b_res = 0.1 * jax.random.normal(ks[11], (Cout,), jnp.float32)

    params = dict(
        groups=groups,
        w1_khwio=jnp.transpose(w1, (2, 3, 1, 0)), b1=b1, g1=g1, be1=be1,
        w2_khwio=jnp.transpose(w2, (2, 3, 1, 0)), b2=b2, g2=g2, be2=be2,
        w_mlp_t=w_mlp.T, b_mlp=b_mlp,
        w_res_io=None if identity else w_res[:, :, 0, 0].T,
        b_res=b_res)
    ref_p = dict(w1=w1, b1=b1, g1=g1, be1=be1, w2=w2, b2=b2, g2=g2, be2=be2,
                 w_mlp=w_mlp, b_mlp=b_mlp, w_res=w_res, b_res=b_res)

    x = jax.random.normal(ks[12], (B, Cin, H, W), jnp.float32)
    temb = jax.random.normal(ks[13], (B, T), jnp.float32)

    if matmul_dtype is None:
        out = resnet_block_forward(params, x, temb)            # production default
    else:
        out = resnet_block_forward(params, x, temb, matmul_dtype=matmul_dtype)
    out = jax.block_until_ready(out)
    ref = jax.block_until_ready(ref_forward(ref_p, x, temb, groups))
    assert out.shape == (B, Cout, H, W)
    err = float(jnp.max(jnp.abs(out - ref)))
    assert jnp.allclose(out, ref, atol=tol, rtol=tol), f"max abs err = {err}"


if __name__ == "__main__":
    key = jax.random.PRNGKey(0)
    k1, k2, k3 = jax.random.split(key, 3)
    # bit-tight checks of the fused kernel with f32 matmul operands
    _run_case(k1, B=2, Cin=8, Cout=16, H=16, W=16, T=32, groups=8,
              matmul_dtype=jnp.float32, tol=3e-3)   # projection residual
    _run_case(k2, B=2, Cin=16, Cout=16, H=16, W=16, T=32, groups=8,
              matmul_dtype=jnp.float32, tol=3e-3)   # identity residual
    # production default (bf16 MXU operands, f32 accumulation) — wider tolerance
    _run_case(k3, B=2, Cin=8, Cout=16, H=16, W=16, T=32, groups=8,
              matmul_dtype=None, tol=1e-1)
    print("KERNEL_OK")
</pallas_src>

<mosaic_0001>
module attributes {stable_mosaic.version = 11 : i64} {
  func.func @_ws_kernel(%arg0: i32, %arg1: memref<72x16xf32, #tpu.memory_space<vmem>>, %arg2: memref<72x16xf32, #tpu.memory_space<vmem>>) attributes {dimension_semantics = [#tpu.dimension_semantics<arbitrary>], iteration_bounds = array<i64: 1>, scalar_prefetch = 0 : i64, scratch_operands = 0 : i64, tpu.core_type = #tpu.core_type<tc>, window_params = [{pipeline_mode = #tpu.pipeline_mode<synchronous>, transform_indices = @transform_0, window_bounds = array<i64: 72, 16>}, {pipeline_mode = #tpu.pipeline_mode<synchronous>, transform_indices = @transform_1, window_bounds = array<i64: 72, 16>}]} {
    %c0 = arith.constant 0 : index
    %c0_0 = arith.constant 0 : index
    %0 = vector.load %arg1[%c0, %c0_0] : memref<72x16xf32, #tpu.memory_space<vmem>>, vector<72x16xf32>
    %cst = arith.constant dense<0.000000e+00> : vector<16xf32>
    %1 = vector.multi_reduction <add>, %0, %cst [0] : vector<72x16xf32> to vector<16xf32>
    %2 = vector.shape_cast %1 : vector<16xf32> to vector<1x16xf32>
    %cst_1 = arith.constant 7.200000e+01 : f32
    %3 = vector.broadcast %cst_1 : f32 to vector<1x16xf32>
    %4 = arith.divf %2, %3 : vector<1x16xf32>
    %5 = vector.broadcast %4 : vector<1x16xf32> to vector<72x16xf32>
    %6 = arith.subf %0, %5 : vector<72x16xf32>
    %7 = arith.mulf %6, %6 : vector<72x16xf32>
    %cst_2 = arith.constant dense<0.000000e+00> : vector<16xf32>
    %8 = vector.multi_reduction <add>, %7, %cst_2 [0] : vector<72x16xf32> to vector<16xf32>
    %9 = vector.shape_cast %8 : vector<16xf32> to vector<1x16xf32>
    %cst_3 = arith.constant 7.200000e+01 : f32
    %10 = vector.broadcast %cst_3 : f32 to vector<1x16xf32>
    %11 = arith.divf %9, %10 : vector<1x16xf32>
    %12 = vector.broadcast %4 : vector<1x16xf32> to vector<72x16xf32>
    %13 = arith.subf %0, %12 : vector<72x16xf32>
    %cst_4 = arith.constant 9.99999974E-6 : f32
    %14 = vector.broadcast %cst_4 : f32 to vector<1x16xf32>
    %15 = arith.addf %11, %14 : vector<1x16xf32>
    %16 = math.rsqrt %15 : vector<1x16xf32>
    %17 = vector.broadcast %16 : vector<1x16xf32> to vector<72x16xf32>
    %18 = arith.mulf %13, %17 : vector<72x16xf32>
    %c0_5 = arith.constant 0 : index
    %c0_6 = arith.constant 0 : index
    %19 = vector.load %arg2[%c0_5, %c0_6] : memref<72x16xf32, #tpu.memory_space<vmem>>, vector<72x16xf32>
    tpu.vector_store %arg2[%c0_5, %c0_6], %18 {strides = array<i32>} : memref<72x16xf32, #tpu.memory_space<vmem>>, vector<72x16xf32>,
    return
  }
  func.func @transform_0(%arg0: i32) -> (i32, i32) {
    %c0_i32 = arith.constant 0 : i32
    %c0_i32_0 = arith.constant 0 : i32
    %c0_i32_1 = arith.constant 0 : i32
    return %c0_i32, %c0_i32_0 : i32, i32
  }
  func.func @transform_1(%arg0: i32) -> (i32, i32) {
    %c0_i32 = arith.constant 0 : i32
    %c0_i32_0 = arith.constant 0 : i32
    %c0_i32_1 = arith.constant 0 : i32
    return %c0_i32, %c0_i32_0 : i32, i32
  }
}

</mosaic_0001>

<bundles_post_ra>
// kernel: tpu_custom_call.1
= control target key start
LH: loop header
LB: loop body
LE: loop exit
PB: predicated region body
PF: predicated region fallthrough
CT: control target
= control target key end

     0   :  { %vm17_vm0 = vcmask 130048   ;;  %s202_s0 = inlined_call_operand.vmem [shape: f32[72,16], index: 0, kind: input, shape index: {}]   ;;  %s203_s1 = inlined_call_operand.vmem [shape: f32[72,16], index: 1, kind: output, shape index: {}]  }
   0x1   :  { %v8_v0 = vld [vmem:[%s202_s0] sm:$0xff]  ;;  %v9_v1 = vld [vmem:[%s202_s0 + $0x8] sm:$0xff]  ;;  %v10_v2 = vld [vmem:[%s202_s0 + $0x10] sm:$0xff] }
   0x2   :  { %v11_v3 = vld [vmem:[%s202_s0 + $0x18] sm:$0xff]  ;;  %v18_v4 = vsel %vm17_vm0, %v8_v0, 0.0  ;;  %v19_v5 = vsel %vm17_vm0, %v9_v1, 0.0  ;;  %v21_v6 = vsel %vm17_vm0, %v10_v2, 0.0  ;;  %v12_v7 = vld [vmem:[%s202_s0 + $0x20] sm:$0xff]  ;;  %v13_v10 = vld [vmem:[%s202_s0 + $0x28] sm:$0xff] }
   0x3   :  { %v20_v8 = vadd.f32 %v19_v5, %v18_v4  ;;  %v23_v9 = vsel %vm17_vm0, %v11_v3, 0.0  ;;  %v25_v12 = vsel %vm17_vm0, %v12_v7, 0.0  ;;  %v14_v13 = vld [vmem:[%s202_s0 + $0x30] sm:$0xff]  ;;  %v27_v15 = vsel %vm17_vm0, %v13_v10, 0.0  ;;  %v15_v16 = vld [vmem:[%s202_s0 + $0x38] sm:$0xff]  ;;  %v16_v19 = vld [vmem:[%s202_s0 + $0x40] sm:$0xff] }
   0x4   :  { %v29_v18 = vsel %vm17_vm0, %v14_v13, 0.0  ;;  %v31_v21 = vsel %vm17_vm0, %v15_v16, 0.0  ;;  %v33_v23 = vsel %vm17_vm0, %v16_v19, 0.0 }
   0x5   :  { %v22_v11 = vadd.f32 %v21_v6, %v20_v8 }
   0x7   :  { %v24_v14 = vadd.f32 %v23_v9, %v22_v11 }
   0x9   :  { %v26_v17 = vadd.f32 %v25_v12, %v24_v14 }
   0xb   :  { %v28_v20 = vadd.f32 %v27_v15, %v26_v17 }
   0xd   :  { %v30_v22 = vadd.f32 %v29_v18, %v28_v20 }
   0xf   :  { %v32_v24 = vadd.f32 %v31_v21, %v30_v22 }
  0x11   :  { %v34_v25 = vadd.f32 %v33_v23, %v32_v24 }
  0x13   :  { %v35_v26 = vrot.slane %v34_v25, 4 }
  0x15   :  { %v36_v27 = vadd.f32 %v35_v26, %v34_v25 }
  0x17   :  { %v37_v28 = vrot.slane %v36_v27, 2 }
  0x19   :  { %v38_v29 = vadd.f32 %v37_v28, %v36_v27 }
  0x1b   :  { %v39_v30 = vrot.slane %v38_v29, 1 }
  0x1d   :  { %v40_v31 = vadd.f32 %v39_v30, %v38_v29 }
  0x1f   :  { %v42_v32 = vmul.f32 0.013888889, %v40_v31 }
  0x21   :  { %v43_v33 = vsub.f32 %v8_v0, %v42_v32  ;;  %v44_v34 = vsub.f32 %v9_v1, %v42_v32  ;;  %v45_v35 = vsub.f32 %v10_v2, %v42_v32  ;;  %v46_v36 = vsub.f32 %v11_v3, %v42_v32 }
  0x22   :  { %v47_v37 = vsub.f32 %v12_v7, %v42_v32  ;;  %v48_v38 = vsub.f32 %v13_v10, %v42_v32  ;;  %v49_v43 = vsub.f32 %v14_v13, %v42_v32  ;;  %v50_v49 = vsub.f32 %v15_v16, %v42_v32 }
  0x23   :  { %v52_v39 = vmul.f32 %v43_v33, %v43_v33  ;;  %v53_v40 = vmul.f32 %v44_v34, %v44_v34  ;;  %v54_v41 = vmul.f32 %v45_v35, %v45_v35  ;;  %v55_v42 = vmul.f32 %v46_v36, %v46_v36 }
  0x24   :  { %v56_v44 = vmul.f32 %v47_v37, %v47_v37  ;;  %v57_v50 = vmul.f32 %v48_v38, %v48_v38  ;;  %v51_v53 = vsub.f32 %v16_v19, %v42_v32  ;;  %v58_v54 = vmul.f32 %v49_v43, %v49_v43 }
  0x25   :  { %v61_v45 = vsel %vm17_vm0, %v52_v39, 0.0  ;;  %v62_v46 = vsel %vm17_vm0, %v53_v40, 0.0  ;;  %v64_v48 = vsel %vm17_vm0, %v54_v41, 0.0  ;;  %v66_v51 = vsel %vm17_vm0, %v55_v42, 0.0 }
  0x26   :  { %v63_v47 = vadd.f32 %v62_v46, %v61_v45  ;;  %v68_v55 = vsel %vm17_vm0, %v56_v44, 0.0  ;;  %v59_v57 = vmul.f32 %v50_v49, %v50_v49  ;;  %v70_v58 = vsel %vm17_vm0, %v57_v50, 0.0 }
  0x27   :  { %v60_v60 = vmul.f32 %v51_v53, %v51_v53  ;;  %v72_v61 = vsel %vm17_vm0, %v58_v54, 0.0 }
  0x28   :  { %v65_v52 = vadd.f32 %v64_v48, %v63_v47  ;;  %v74_v63 = vsel %vm17_vm0, %v59_v57, 0.0 }
  0x29   :  { %v76_v1 = vsel %vm17_vm0, %v60_v60, 0.0 }
  0x2a   :  { %v67_v56 = vadd.f32 %v66_v51, %v65_v52 }
  0x2c   :  { %v69_v59 = vadd.f32 %v68_v55, %v67_v56 }
  0x2e   :  { %v71_v62 = vadd.f32 %v70_v58, %v69_v59 }
  0x30   :  { %v73_v0 = vadd.f32 %v72_v61, %v71_v62 }
  0x32   :  { %v75_v2 = vadd.f32 %v74_v63, %v73_v0 }
  0x34   :  { %v77_v3 = vadd.f32 %v76_v1, %v75_v2 }
  0x36   :  { %v78_v4 = vrot.slane %v77_v3, 4 }
  0x38   :  { %v79_v5 = vadd.f32 %v78_v4, %v77_v3 }
  0x3a   :  { %v80_v6 = vrot.slane %v79_v5, 2 }
  0x3c   :  { %v81_v7 = vadd.f32 %v80_v6, %v79_v5 }
  0x3e   :  { %v82_v8 = vrot.slane %v81_v7, 1 }
  0x40   :  { %v83_v9 = vadd.f32 %v82_v8, %v81_v7 }
  0x42   :  { %v84_v10 = vmul.f32 0.013888889, %v83_v9 }
  0x44   :  { %v85_v11 = vadd.f32 1e-05, %v84_v10 }
  0x46   :  { %109 = vrsqrt.f32 %v85_v11 }
  0x50   :  { %v110_v12 = vpop.eup %109 }
  0x51   :  { %v87_v13 = vmul.f32 %v110_v12, %v43_v33  ;;  %v88_v14 = vmul.f32 %v110_v12, %v44_v34  ;;  %v89_v15 = vmul.f32 %v110_v12, %v45_v35  ;;  %v90_v16 = vmul.f32 %v110_v12, %v46_v36 }
  0x52   :  { %v91_v17 = vmul.f32 %v110_v12, %v47_v37  ;;  %v92_v18 = vmul.f32 %v110_v12, %v48_v38  ;;  %v93_v19 = vmul.f32 %v110_v12, %v49_v43  ;;  %v94_v20 = vmul.f32 %v110_v12, %v50_v49 }
  0x53   :  { %96 = vst.msk [vmem:[%s203_s1] sm:$0xff] %vm17_vm0, %v87_v13  ;;  %97 = vst.msk [vmem:[%s203_s1 + $0x8] sm:$0xff] %vm17_vm0, %v88_v14  ;;  %v95_v21 = vmul.f32 %v110_v12, %v51_v53 }
  0x54   :  { %98 = vst.msk [vmem:[%s203_s1 + $0x10] sm:$0xff] %vm17_vm0, %v89_v15  ;;  %99 = vst.msk [vmem:[%s203_s1 + $0x18] sm:$0xff] %vm17_vm0, %v90_v16 }
  0x55   :  { %100 = vst.msk [vmem:[%s203_s1 + $0x20] sm:$0xff] %vm17_vm0, %v91_v17  ;;  %101 = vst.msk [vmem:[%s203_s1 + $0x28] sm:$0xff] %vm17_vm0, %v92_v18 }
  0x56   :  { %102 = vst.msk [vmem:[%s203_s1 + $0x30] sm:$0xff] %vm17_vm0, %v93_v19  ;;  %103 = vst.msk [vmem:[%s203_s1 + $0x38] sm:$0xff] %vm17_vm0, %v94_v20 }
  0x57   :  { %104 = vst.msk [vmem:[%s203_s1 + $0x40] sm:$0xff] %vm17_vm0, %v95_v21 }

</bundles_post_ra>
